<compile_context>
chip_gen: v6e
topology: v6e:2x2x1
jax: 0.10.0
libtpu: 0.0.40
codegen_flags: <defaults>
</compile_context>

<pallas_src>
import functools

import jax
import jax.numpy as jnp
from jax.experimental import pallas as pl
from jax.experimental.pallas import tpu as pltpu


def _label_gather_kernel(labels_ref, table_ref, out_ref, *, group: int):
    """labels_ref: (B_pad,) int32 in SMEM (scalar prefetch).
    table_ref:  (V, H) embedding table, VMEM-resident (constant block index -> one DMA).
    out_ref:    (group, H) output block for this grid step."""
    i = pl.program_id(0)
    base = i * group
    # Statically unrolled: each iteration is one SMEM scalar read plus a
    # VMEM->VMEM row copy; the whole (group, H) block is then written back to
    # HBM as a single dense DMA.
    for k in range(group):
        lbl = labels_ref[base + k]
        out_ref[pl.ds(k, 1), :] = table_ref[pl.ds(lbl, 1), :]


def _round_up(x: int, m: int) -> int:
    return (x + m - 1) // m * m


def label_embedder_forward(
    labels,
    embedding_table,
    *,
    num_classes,
    dropout_prob,
    train,
    key=None,
    force_drop_ids=None,
    use_pallas=None,
):
    """Pallas equivalent of LabelEmbedder.forward(labels, train, force_drop_ids)."""
    B = labels.shape[0]
    V, H = embedding_table.shape
    use_dropout = dropout_prob > 0
    labels = labels.astype(jnp.int32)

    # ---- token_drop semantics (cheap (B,) int logic, kept in the wrapper) ----
    if (train and use_dropout) or (force_drop_ids is not None):
        if not use_dropout:
            # PyTorch's nn.Embedding would raise an out-of-range index error here
            # (there is no CFG null row when dropout_prob == 0).
            raise ValueError(
                "force_drop_ids requires dropout_prob > 0 (table has no null-class row)"
            )
        if force_drop_ids is None:
            assert key is not None, "need a PRNG key for random token drop"
            drop = jax.random.uniform(key, (B,)) < dropout_prob
        else:
            drop = force_drop_ids == 1
        labels = jnp.where(drop, jnp.int32(num_classes), labels)

    # Defensive clamp: an out-of-range label would otherwise read stale VMEM
    # (no runtime bounds check on in-kernel VMEM indexing).
    labels = jnp.clip(labels, 0, V - 1)

    itemsize = jnp.dtype(embedding_table.dtype).itemsize
    table_bytes = V * H * itemsize

    # ---- wrapper-level dispatch ----
    if use_pallas is None:
        # For tiny outputs the fixed pallas_call overhead dwarfs an XLA gather.
        use_pallas = (B * H * itemsize) >= (1 << 20)
    vmem_budget = 48 << 20  # conservative vs. v7x's 64 MiB physical VMEM
    if (not use_pallas) or (2 * table_bytes > vmem_budget):
        # TODO(synk): for tables too large to pin in VMEM, add the grouped
        # per-row manual-DMA gather (memory_space=pl.ANY + make_async_copy).
        return jnp.take(embedding_table, labels, axis=0)

    # ---- grouped, table-resident Pallas gather ----
    sublane = 8 * (4 // itemsize)            # 8 rows (f32) / 16 (bf16) / 32 (i8)
    G = min(_round_up(B, sublane), 128)      # sublane-dense output block
    B_pad = _round_up(B, G)
    labels_padded = labels
    if B_pad != B:
        labels_padded = jnp.pad(labels, (0, B_pad - B))  # pad with label 0 (valid row)

    out_block_bytes = G * H * itemsize
    vmem_limit = int(
        min(max(2 * table_bytes + 2 * out_block_bytes + (4 << 20), 32 << 20), 64 << 20)
    )

    grid_spec = pltpu.PrefetchScalarGridSpec(
        num_scalar_prefetch=1,
        grid=(B_pad // G,),
        in_specs=[
            # Whole table; constant block index -> fetched into VMEM exactly once.
            pl.BlockSpec((V, H), lambda i, lbl: (0, 0)),
        ],
        out_specs=pl.BlockSpec((G, H), lambda i, lbl: (i, 0)),
    )

    out = pl.pallas_call(
        functools.partial(_label_gather_kernel, group=G),
        out_shape=jax.ShapeDtypeStruct((B_pad, H), embedding_table.dtype),
        grid_spec=grid_spec,
        compiler_params=pltpu.CompilerParams(
            dimension_semantics=("parallel",),  # independent output blocks
            vmem_limit_bytes=vmem_limit,
        ),
    )(labels_padded, embedding_table)

    return out[:B]


if __name__ == "__main__":
    # Small, lane-aligned sizes (H multiple of 128 -> unmasked vst).
    num_classes = 15          # -> table has num_classes + 1 = 16 rows (CFG null row)
    hidden_size = 128
    dropout_prob = 0.1
    batch = 8

    root = jax.random.PRNGKey(0)
    k_table, k_labels, k_drop = jax.random.split(root, 3)

    use_cfg_embedding = int(dropout_prob > 0)
    table = jax.random.normal(
        k_table, (num_classes + use_cfg_embedding, hidden_size), dtype=jnp.float32
    )
    labels = jax.random.randint(k_labels, (batch,), 0, num_classes, dtype=jnp.int32)

    # Training-mode forward (random token drop, deterministic given key).
    out_train = label_embedder_forward(
        labels, table,
        num_classes=num_classes, dropout_prob=dropout_prob,
        train=True, key=k_drop, use_pallas=True,
    )
    out_train = jax.block_until_ready(out_train)
    assert out_train.shape == (batch, hidden_size)
    drop_ref = jax.random.uniform(k_drop, (batch,)) < dropout_prob
    ref_train = table[jnp.where(drop_ref, num_classes, labels)]
    assert jnp.array_equal(out_train, ref_train), "train-mode mismatch"

    # Eval-mode forward (no drop): must exactly equal a plain gather.
    out_eval = label_embedder_forward(
        labels, table,
        num_classes=num_classes, dropout_prob=dropout_prob,
        train=False, use_pallas=True,
    )
    out_eval = jax.block_until_ready(out_eval)
    assert out_eval.shape == (batch, hidden_size)
    assert jnp.array_equal(out_eval, table[labels]), "eval mismatch vs reference gather"

    # Forced-drop forward: drop every label -> all rows equal the null embedding.
    force = jnp.ones((batch,), dtype=jnp.int32)
    out_forced = label_embedder_forward(
        labels, table,
        num_classes=num_classes, dropout_prob=dropout_prob,
        train=False, force_drop_ids=force, use_pallas=True,
    )
    out_forced = jax.block_until_ready(out_forced)
    assert jnp.array_equal(
        out_forced, jnp.broadcast_to(table[num_classes], out_forced.shape)
    )

    # Mixed forced-drop (drop even batch indices only).
    force_mixed = (jnp.arange(batch) % 2 == 0).astype(jnp.int32)
    out_mixed = label_embedder_forward(
        labels, table,
        num_classes=num_classes, dropout_prob=dropout_prob,
        train=False, force_drop_ids=force_mixed, use_pallas=True,
    )
    out_mixed = jax.block_until_ready(out_mixed)
    ref_mixed = table[jnp.where(force_mixed == 1, num_classes, labels)]
    assert jnp.array_equal(out_mixed, ref_mixed)

    print("KERNEL_OK")
</pallas_src>

<mosaic_0001>
module attributes {stable_mosaic.version = 11 : i64} {
  func.func @_label_gather_kernel(%arg0: i32, %arg1: memref<8xi32, #tpu.memory_space<smem>>, %arg2: memref<16x128xf32, #tpu.memory_space<vmem>>, %arg3: memref<8x128xf32, #tpu.memory_space<vmem>>) attributes {dimension_semantics = [#tpu.dimension_semantics<parallel>], iteration_bounds = array<i64: 1>, scalar_prefetch = 1 : i64, scratch_operands = 0 : i64, tpu.core_type = #tpu.core_type<tc>, window_params = [{pipeline_mode = #tpu.pipeline_mode<synchronous>, transform_indices = @transform_0, window_bounds = array<i64: 16, 128>}, {transform_indices = @transform_1, window_bounds = array<i64: 8, 128>}]} {
    %c8_i32 = arith.constant 8 : i32
    %0 = arith.muli %arg0, %c8_i32 : i32
    %c0_i32 = arith.constant 0 : i32
    %1 = arith.addi %0, %c0_i32 : i32
    %2 = arith.index_cast %1 : i32 to index
    %3 = memref.load %arg1[%2] : memref<8xi32, #tpu.memory_space<smem>>
    %4 = arith.index_cast %3 : i32 to index
    %c0 = arith.constant 0 : index
    %5 = vector.load %arg2[%4, %c0] : memref<16x128xf32, #tpu.memory_space<vmem>>, vector<1x128xf32>
    %c0_0 = arith.constant 0 : index
    %c0_1 = arith.constant 0 : index
    %6 = vector.load %arg3[%c0_0, %c0_1] : memref<8x128xf32, #tpu.memory_space<vmem>>, vector<1x128xf32>
    tpu.vector_store %arg3[%c0_0, %c0_1], %5 {strides = array<i32>} : memref<8x128xf32, #tpu.memory_space<vmem>>, vector<1x128xf32>,
    %c1_i32 = arith.constant 1 : i32
    %7 = arith.addi %0, %c1_i32 : i32
    %8 = arith.index_cast %7 : i32 to index
    %9 = memref.load %arg1[%8] : memref<8xi32, #tpu.memory_space<smem>>
    %10 = arith.index_cast %9 : i32 to index
    %c0_2 = arith.constant 0 : index
    %11 = vector.load %arg2[%10, %c0_2] : memref<16x128xf32, #tpu.memory_space<vmem>>, vector<1x128xf32>
    %c1 = arith.constant 1 : index
    %c0_3 = arith.constant 0 : index
    %12 = vector.load %arg3[%c1, %c0_3] : memref<8x128xf32, #tpu.memory_space<vmem>>, vector<1x128xf32>
    tpu.vector_store %arg3[%c1, %c0_3], %11 {strides = array<i32>} : memref<8x128xf32, #tpu.memory_space<vmem>>, vector<1x128xf32>,
    %c2_i32 = arith.constant 2 : i32
    %13 = arith.addi %0, %c2_i32 : i32
    %14 = arith.index_cast %13 : i32 to index
    %15 = memref.load %arg1[%14] : memref<8xi32, #tpu.memory_space<smem>>
    %16 = arith.index_cast %15 : i32 to index
    %c0_4 = arith.constant 0 : index
    %17 = vector.load %arg2[%16, %c0_4] : memref<16x128xf32, #tpu.memory_space<vmem>>, vector<1x128xf32>
    %c2 = arith.constant 2 : index
    %c0_5 = arith.constant 0 : index
    %18 = vector.load %arg3[%c2, %c0_5] : memref<8x128xf32, #tpu.memory_space<vmem>>, vector<1x128xf32>
    tpu.vector_store %arg3[%c2, %c0_5], %17 {strides = array<i32>} : memref<8x128xf32, #tpu.memory_space<vmem>>, vector<1x128xf32>,
    %c3_i32 = arith.constant 3 : i32
    %19 = arith.addi %0, %c3_i32 : i32
    %20 = arith.index_cast %19 : i32 to index
    %21 = memref.load %arg1[%20] : memref<8xi32, #tpu.memory_space<smem>>
    %22 = arith.index_cast %21 : i32 to index
    %c0_6 = arith.constant 0 : index
    %23 = vector.load %arg2[%22, %c0_6] : memref<16x128xf32, #tpu.memory_space<vmem>>, vector<1x128xf32>
    %c3 = arith.constant 3 : index
    %c0_7 = arith.constant 0 : index
    %24 = vector.load %arg3[%c3, %c0_7] : memref<8x128xf32, #tpu.memory_space<vmem>>, vector<1x128xf32>
    tpu.vector_store %arg3[%c3, %c0_7], %23 {strides = array<i32>} : memref<8x128xf32, #tpu.memory_space<vmem>>, vector<1x128xf32>,
    %c4_i32 = arith.constant 4 : i32
    %25 = arith.addi %0, %c4_i32 : i32
    %26 = arith.index_cast %25 : i32 to index
    %27 = memref.load %arg1[%26] : memref<8xi32, #tpu.memory_space<smem>>
    %28 = arith.index_cast %27 : i32 to index
    %c0_8 = arith.constant 0 : index
    %29 = vector.load %arg2[%28, %c0_8] : memref<16x128xf32, #tpu.memory_space<vmem>>, vector<1x128xf32>
    %c4 = arith.constant 4 : index
    %c0_9 = arith.constant 0 : index
    %30 = vector.load %arg3[%c4, %c0_9] : memref<8x128xf32, #tpu.memory_space<vmem>>, vector<1x128xf32>
    tpu.vector_store %arg3[%c4, %c0_9], %29 {strides = array<i32>} : memref<8x128xf32, #tpu.memory_space<vmem>>, vector<1x128xf32>,
    %c5_i32 = arith.constant 5 : i32
    %31 = arith.addi %0, %c5_i32 : i32
    %32 = arith.index_cast %31 : i32 to index
    %33 = memref.load %arg1[%32] : memref<8xi32, #tpu.memory_space<smem>>
    %34 = arith.index_cast %33 : i32 to index
    %c0_10 = arith.constant 0 : index
    %35 = vector.load %arg2[%34, %c0_10] : memref<16x128xf32, #tpu.memory_space<vmem>>, vector<1x128xf32>
    %c5 = arith.constant 5 : index
    %c0_11 = arith.constant 0 : index
    %36 = vector.load %arg3[%c5, %c0_11] : memref<8x128xf32, #tpu.memory_space<vmem>>, vector<1x128xf32>
    tpu.vector_store %arg3[%c5, %c0_11], %35 {strides = array<i32>} : memref<8x128xf32, #tpu.memory_space<vmem>>, vector<1x128xf32>,
    %c6_i32 = arith.constant 6 : i32
    %37 = arith.addi %0, %c6_i32 : i32
    %38 = arith.index_cast %37 : i32 to index
    %39 = memref.load %arg1[%38] : memref<8xi32, #tpu.memory_space<smem>>
    %40 = arith.index_cast %39 : i32 to index
    %c0_12 = arith.constant 0 : index
    %41 = vector.load %arg2[%40, %c0_12] : memref<16x128xf32, #tpu.memory_space<vmem>>, vector<1x128xf32>
    %c6 = arith.constant 6 : index
    %c0_13 = arith.constant 0 : index
    %42 = vector.load %arg3[%c6, %c0_13] : memref<8x128xf32, #tpu.memory_space<vmem>>, vector<1x128xf32>
    tpu.vector_store %arg3[%c6, %c0_13], %41 {strides = array<i32>} : memref<8x128xf32, #tpu.memory_space<vmem>>, vector<1x128xf32>,
    %c7_i32 = arith.constant 7 : i32
    %43 = arith.addi %0, %c7_i32 : i32
    %44 = arith.index_cast %43 : i32 to index
    %45 = memref.load %arg1[%44] : memref<8xi32, #tpu.memory_space<smem>>
    %46 = arith.index_cast %45 : i32 to index
    %c0_14 = arith.constant 0 : index
    %47 = vector.load %arg2[%46, %c0_14] : memref<16x128xf32, #tpu.memory_space<vmem>>, vector<1x128xf32>
    %c7 = arith.constant 7 : index
    %c0_15 = arith.constant 0 : index
    %48 = vector.load %arg3[%c7, %c0_15] : memref<8x128xf32, #tpu.memory_space<vmem>>, vector<1x128xf32>
    tpu.vector_store %arg3[%c7, %c0_15], %47 {strides = array<i32>} : memref<8x128xf32, #tpu.memory_space<vmem>>, vector<1x128xf32>,
    return
  }
  func.func @transform_0(%arg0: i32, %arg1: memref<8xi32, #tpu.memory_space<smem>>) -> (i32, i32) {
    %c0_i32 = arith.constant 0 : i32
    %c0_i32_0 = arith.constant 0 : i32
    %c0_i32_1 = arith.constant 0 : i32
    return %c0_i32, %c0_i32_0 : i32, i32
  }
  func.func @transform_1(%arg0: i32, %arg1: memref<8xi32, #tpu.memory_space<smem>>) -> (i32, i32) {
    %c0_i32 = arith.constant 0 : i32
    %c0_i32_0 = arith.constant 0 : i32
    return %arg0, %c0_i32 : i32, i32
  }
}

</mosaic_0001>

<bundles_post_ra>
// kernel: tpu_custom_call.1
= control target key start
LH: loop header
LB: loop body
LE: loop exit
PB: predicated region body
PF: predicated region fallthrough
CT: control target
= control target key end

     0   :  { %s157_s9 = smov [#allocation3]   ;;  %s186_s0 = inlined_call_operand.hbm [shape: s32[8], index: 0, kind: input, shape index: {}]   ;;  %s187_s1 = inlined_call_operand.hbm [shape: f32[16,128], index: 1, kind: input, shape index: {}]   ;;  %s188_s2 = inlined_call_operand.hbm [shape: f32[8,128], index: 2, kind: output, shape index: {}]  }
   0x1   :  { %8 = dma.hbm_to_smem %s186_s0, 16, %s157_s9, [#allocation2] }
   0x2   :  { %151 = dma.done.wait [#allocation2], 16 }
   0x3   :  { %152 = vsyncadd [#allocation2], 4294967280 }
   0x4   :  { %10 = sfence }
   0x5   :  { %11 = vsyncpa [#allocation5], 0 }
   0x6   :  { %12 = vsyncpa [#allocation6], 0  ;;  %s158_s12 = smov [#allocation4]  }
   0x7   :  { %s18_s13 = sshll.u32 %s158_s12, 4  ;;  %s19_s13 = int_to_ptr.vmem [resolvable:$true] %s18_s13 }
   0x8   :  { %s119_s14 = scalar_lea.vmem %s19_s13, 256  ;;  %p124_p1 = scmp.lt.s32.totalorder %s19_s13, %s19_s13 }
   0x9   :  { %p120_p0 = scmp.ne.s32.totalorder %s19_s13, %s119_s14  ;;  %p125_p2 = scmp.lt.s32.totalorder %s119_s14, %s119_s14 }
   0xb   :  { %p126_p3 = por %p125_p2, %p124_p1 }
   0xd   :  { %p127_p4 = pnand %p126_p3, %p120_p0 }
   0xf   :  { %130 = shalt.err (!%p127_p4)
}
  0x10   :  { %s159_s15 = smov 128   ;;  %s160_s16 = smov 8  }
  0x11   :  { %24 = dma.hbm_to_vmem [thread:$0]  %s187_s1, 256, %s19_s13, [#allocation5], %s159_s15, %s159_s15, %s160_s16  }
  0x12   :  { %153 = dma.done.wait [#allocation5], 256  }
  0x13   :  { %154 = vsyncadd [#allocation5], 4294967040  ;;  %s29_s0 = sld [smem:[#allocation3]]  ;;  %s161_s29 = smov [#allocation7]  }
  0x14   :  { %s91_s19 = sld [smem:[#allocation3 + $0x1]]  ;;  %s74_s30 = sshll.u32 %s161_s29, 4  ;;  %s75_s30 = int_to_ptr.vmem [resolvable:$true] %s74_s30 }
  0x15   :  { %s92_s20 = sld [smem:[#allocation3 + $0x2]]  ;;  %s131_s7 = scalar_lea.vmem %s75_s30, 128 }
  0x16   :  { %s93_s21 = sld [smem:[#allocation3 + $0x3]]  ;;  %p132_p5 = scmp.ne.s32.totalorder %s75_s30, %s131_s7 }
  0x17   :  { %s94_s22 = sld [smem:[#allocation3 + $0x4]]  ;;  %p136_p6 = scmp.lt.s32.totalorder %s75_s30, %s75_s30 }
  0x18   :  { %s95_s23 = sld [smem:[#allocation3 + $0x5]]  ;;  %p137_p7 = scmp.lt.s32.totalorder %s131_s7, %s131_s7 }
  0x19   :  { %s96_s24 = sld [smem:[#allocation3 + $0x6]]  ;;  %s30_s25 = scalar_lea.vmem [#allocation4], %s29_s0 }
  0x1a   :  { %v31_v0 = vld [vmem:[%s30_s25] sm:$0x1]  ;;  %s97_s26 = sld [smem:[#allocation3 + $0x7]]  ;;  %s35_s27 = scalar_lea.vmem [#allocation4], %s91_s19 }
  0x1b   :  { %32 = vst [vmem:[#allocation7] sm:$0x1] %v31_v0  ;;  %v36_v1 = vld [vmem:[%s35_s27] sm:$0x1]  ;;  %s40_s28 = scalar_lea.vmem [#allocation4], %s92_s20  ;;  %p138_p8 = por %p137_p7, %p136_p6 }
  0x1c   :  { %37 = vst [vmem:[#allocation7 + $0x1] sm:$0x1] %v36_v1  ;;  %v41_v2 = vld [vmem:[%s40_s28] sm:$0x1]  ;;  %s45_s1 = scalar_lea.vmem [#allocation4], %s93_s21 }
  0x1d   :  { %42 = vst [vmem:[#allocation7 + $0x2] sm:$0x1] %v41_v2  ;;  %v46_v3 = vld [vmem:[%s45_s1] sm:$0x1]  ;;  %s50_s3 = scalar_lea.vmem [#allocation4], %s94_s22  ;;  %p139_p9 = pnand %p138_p8, %p132_p5 }
  0x1e   :  { %47 = vst [vmem:[#allocation7 + $0x3] sm:$0x1] %v46_v3  ;;  %v51_v4 = vld [vmem:[%s50_s3] sm:$0x1]  ;;  %s55_s4 = scalar_lea.vmem [#allocation4], %s95_s23 }
  0x1f   :  { %52 = vst [vmem:[#allocation7 + $0x4] sm:$0x1] %v51_v4  ;;  %v56_v5 = vld [vmem:[%s55_s4] sm:$0x1]  ;;  %s60_s5 = scalar_lea.vmem [#allocation4], %s96_s24 }
  0x20   :  { %57 = vst [vmem:[#allocation7 + $0x5] sm:$0x1] %v56_v5  ;;  %v61_v6 = vld [vmem:[%s60_s5] sm:$0x1]  ;;  %s65_s6 = scalar_lea.vmem [#allocation4], %s97_s26 }
  0x21   :  { %62 = vst [vmem:[#allocation7 + $0x6] sm:$0x1] %v61_v6  ;;  %v66_v7 = vld [vmem:[%s65_s6] sm:$0x1] }
  0x22   :  { %67 = vst [vmem:[#allocation7 + $0x7] sm:$0x1] %v66_v7 }
  0x23   :  { %142 = shalt.err (!%p139_p9)
}
  0x24   :  { %77 = dma.vmem_to_hbm [thread:$0]  %s75_s30, 128, %s188_s2, [#allocation6]  }
  0x25   :  { %155 = dma.done.wait [#allocation6], 128  }
  0x26   :  { %156 = vsyncadd [#allocation6], 4294967168 }
  0x27   :  { %81 = vsyncpa [#allocation5], 1 }
  0x28   :  { %82 = vsyncpa [#allocation6], 1 }

</bundles_post_ra>
